<compile_context>
chip_gen: v7x
topology: tpu7x:2x2x1
jax: 0.10.0
libtpu: 0.0.40
codegen_flags: <defaults>
</compile_context>

<pallas_src>
import functools

import jax
import jax.numpy as jnp
from jax import lax
from jax.experimental import pallas as pl
from jax.experimental.pallas import tpu as pltpu


def _round_up(x, m):
    return -(-x // m) * m


def _hw_budgets():
    """(per-input block bytes, vmem_limit_bytes), gated on TPU generation."""
    try:
        info = pltpu.get_tpu_info()
        cap = getattr(info, "vmem_capacity_bytes", None)
    except Exception:
        cap = None
    if cap is None:
        cap = 64 * 1024 * 1024                      # conservative (v7x-class)
    if cap <= 64 * 1024 * 1024:
        # v7x: 64 MiB physical VMEM/TC -> 8 MiB blocks (2 in x 2 buf = 32 MiB).
        return 8 * 1024 * 1024, 44 * 1024 * 1024
    # v5e / v6e: 128 MiB VMEM -> 16 MiB blocks (2 in x 2 buf = 64 MiB).
    return 16 * 1024 * 1024, 80 * 1024 * 1024


def _pick_tiling(rows, lanes, itemsize, block_bytes):
    """Choose (tile_r, groups, num_blocks, need_mask, psub) for a (rows, lanes) slab."""
    bytes_per_row = _round_up(lanes, 128) * itemsize      # physical lane-padded width
    target_rows = max(8, (block_bytes // bytes_per_row) // 8 * 8)
    if rows < 8:
        tile_r = rows                                      # block == full dim
        groups = None
        psub = 1
    else:
        tile_r = min(target_rows, (rows // 8) * 8)         # multiple of 8, <= rows
        groups = tile_r // 8
        psub = 8
    num_blocks = pl.cdiv(rows, tile_r)
    need_mask = (rows % tile_r) != 0
    return tile_r, groups, num_blocks, need_mask, psub


# ----------------------------------------------------------------------------
# MSE-only kernel (module default: ce_weight == 0)
# ----------------------------------------------------------------------------
def _mse_dense_kernel(stu_ref, tea_ref, out_ref, *, rows_total, tile_r, groups,
                      need_mask):
    stu = stu_ref[...].astype(jnp.float32)                 # (tile_r, L)
    tea = tea_ref[...].astype(jnp.float32)
    diff = stu - tea
    if need_mask:
        i = pl.program_id(0)
        row = i * tile_r + lax.broadcasted_iota(jnp.int32, diff.shape, 0)
        diff = jnp.where(row < rows_total, diff, 0.0)      # mask BEFORE squaring
    sq = diff * diff
    if groups is None:
        out_ref[0] = jnp.sum(sq, axis=0, keepdims=True)    # (1, L)
    else:
        # Per-vreg adds across sublane groups -> (8, L) vector partial.
        out_ref[0] = jnp.sum(sq.reshape(groups, 8, sq.shape[-1]), axis=0)


def _mse_only_path(stu, tea, mse_weight, block_bytes, vmem_limit):
    n, c = stu.shape
    total = n * c

    # Lane-dense view only when it is a free (bitcast) reshape.
    lanes = None
    for cand in (512, 256, 128):
        if total % cand == 0:
            lanes = cand
            break
    if lanes is not None:
        rows = total // lanes
        stu2 = stu.reshape(rows, lanes)
        tea2 = tea.reshape(rows, lanes)
    else:
        rows, lanes = n, c
        stu2, tea2 = stu, tea

    tile_r, groups, num_blocks, need_mask, psub = _pick_tiling(
        rows, lanes, stu.dtype.itemsize, block_bytes)

    kernel = functools.partial(_mse_dense_kernel, rows_total=rows, tile_r=tile_r,
                               groups=groups, need_mask=need_mask)

    partials = pl.pallas_call(
        kernel,
        out_shape=jax.ShapeDtypeStruct((num_blocks, psub, lanes), jnp.float32),
        grid_spec=pltpu.PrefetchScalarGridSpec(
            num_scalar_prefetch=0,
            grid=(num_blocks,),
            in_specs=[
                pl.BlockSpec((tile_r, lanes), lambda i: (i, 0)),
                pl.BlockSpec((tile_r, lanes), lambda i: (i, 0)),
            ],
            out_specs=pl.BlockSpec((1, psub, lanes), lambda i: (i, 0, 0)),
        ),
        # "parallel" lets the runtime shard the block axis across TensorCores
        # where supported (per-block output slots make this race-free).
        compiler_params=pltpu.CompilerParams(
            dimension_semantics=("parallel",),
            vmem_limit_bytes=vmem_limit),
    )(stu2, tea2)

    inv_nc = 1.0 / float(total)                            # Python double precision
    return (mse_weight * inv_nc) * jnp.sum(partials, dtype=jnp.float32)


# ----------------------------------------------------------------------------
# Row-structured kernel: CE term active, MSE optional (single read of logits)
# ----------------------------------------------------------------------------
def _mse_ce_kernel(*refs, compute_mse, n_total, tile_b, groups, need_mask):
    if compute_mse:
        stu_ref, tea_ref, gt_ref, mse_out_ref, ce_out_ref = refs
    else:
        stu_ref, gt_ref, ce_out_ref = refs
        tea_ref = mse_out_ref = None

    stu = stu_ref[...].astype(jnp.float32)                 # (tile_b, C)

    valid = None
    if need_mask:
        i = pl.program_id(0)
        row = i * tile_b + lax.broadcasted_iota(jnp.int32, stu.shape, 0)
        valid = row < n_total
        stu = jnp.where(valid, stu, 0.0)                   # mask BEFORE exp/logsumexp

    def _fold(x):
        # (tile_b, w) -> (psub, w) vector partial using only whole-vreg adds.
        if groups is None:
            return jnp.sum(x, axis=0, keepdims=True)
        return jnp.sum(x.reshape(groups, 8, x.shape[-1]), axis=0)

    if compute_mse:
        diff = stu - tea_ref[...].astype(jnp.float32)
        if need_mask:
            diff = jnp.where(valid, diff, 0.0)             # mask BEFORE squaring
        mse_out_ref[0] = _fold(diff * diff)

    # Numerically stable logsumexp + gather-by-iota-compare.
    row_max = jnp.max(stu, axis=-1, keepdims=True)                      # (tile_b, 1)
    lse = jnp.log(jnp.sum(jnp.exp(stu - row_max), axis=-1,
                          keepdims=True)) + row_max                     # (tile_b, 1)
    gt = gt_ref[...]                                                    # (tile_b, 1)
    col = lax.broadcasted_iota(jnp.int32, stu.shape, 1)
    picked = jnp.sum(jnp.where(col == gt, stu, 0.0),
                     axis=-1, keepdims=True)                            # (tile_b, 1)
    ce = lse - picked
    if need_mask:
        ce = jnp.where(valid[:, :1], ce, 0.0)
    ce_out_ref[0] = _fold(ce)                                           # (psub, 1)


def _mse_ce_path(stu, tea, gt, mse_weight, ce_weight, block_bytes, vmem_limit):
    n, c = stu.shape
    compute_mse = (mse_weight != 0.0)

    # Budget with the lane-padded width (real VMEM footprint), and with both
    # inputs when the MSE term is active.
    eff_block = block_bytes if compute_mse else 2 * block_bytes
    tile_b, groups, num_blocks, need_mask, psub = _pick_tiling(
        n, c, stu.dtype.itemsize, eff_block // (2 if compute_mse else 1))

    gt2d = gt.astype(jnp.int32).reshape(n, 1)

    kernel = functools.partial(
        _mse_ce_kernel, compute_mse=compute_mse, n_total=n, tile_b=tile_b,
        groups=groups, need_mask=need_mask)

    stu_spec = pl.BlockSpec((tile_b, c), lambda i: (i, 0))
    gt_spec = pl.BlockSpec((tile_b, 1), lambda i: (i, 0))
    ce_out_shape = jax.ShapeDtypeStruct((num_blocks, psub, 1), jnp.float32)
    ce_out_spec = pl.BlockSpec((1, psub, 1), lambda i: (i, 0, 0))

    if compute_mse:
        in_specs = [stu_spec, pl.BlockSpec((tile_b, c), lambda i: (i, 0)), gt_spec]
        args = (stu, tea, gt2d)
        out_shape = (jax.ShapeDtypeStruct((num_blocks, psub, c), jnp.float32),
                     ce_out_shape)
        out_specs = (pl.BlockSpec((1, psub, c), lambda i: (i, 0, 0)), ce_out_spec)
    else:
        # Teacher logits are never DMA'd when the MSE term is statically off.
        in_specs = [stu_spec, gt_spec]
        args = (stu, gt2d)
        out_shape = ce_out_shape
        out_specs = ce_out_spec

    outs = pl.pallas_call(
        kernel,
        out_shape=out_shape,
        grid_spec=pltpu.PrefetchScalarGridSpec(
            num_scalar_prefetch=0,
            grid=(num_blocks,),
            in_specs=in_specs,
            out_specs=out_specs,
        ),
        compiler_params=pltpu.CompilerParams(
            dimension_semantics=("parallel",),
            vmem_limit_bytes=vmem_limit),
    )(*args)

    inv_nc = 1.0 / float(n * c)                            # Python double precision
    inv_n = 1.0 / float(n)
    if compute_mse:
        mse_partials, ce_partials = outs
        mse_total = jnp.sum(mse_partials, dtype=jnp.float32)
        ce_total = jnp.sum(ce_partials, dtype=jnp.float32)
        return (mse_weight * inv_nc) * mse_total + (ce_weight * inv_n) * ce_total
    ce_total = jnp.sum(outs, dtype=jnp.float32)
    return (ce_weight * inv_n) * ce_total


# ----------------------------------------------------------------------------
# Public entry point (Pallas equivalent of MSEGTLoss.forward)
# ----------------------------------------------------------------------------
def mse_gt_loss(stu_outputs, tea_outputs, ground_truth,
                mse_weight=1.0, ce_weight=0.0):
    """stu_outputs, tea_outputs: (N, C) logits (f32 or bf16); ground_truth: (N,) ids.

    mse_weight / ce_weight must be static Python numbers: they decide at trace
    time which loss terms (and which HBM reads) exist.
    """
    mse_weight = float(mse_weight)   # raises a clear error if traced under jit
    ce_weight = float(ce_weight)
    block_bytes, vmem_limit = _hw_budgets()
    if ce_weight == 0.0:
        if mse_weight == 0.0:
            return jnp.float32(0.0)
        return _mse_only_path(stu_outputs, tea_outputs, mse_weight,
                              block_bytes, vmem_limit)
    return _mse_ce_path(stu_outputs, tea_outputs, ground_truth,
                        mse_weight, ce_weight, block_bytes, vmem_limit)


# ----------------------------------------------------------------------------
# Pure-JAX reference + self-test
# ----------------------------------------------------------------------------
def _reference(stu, tea, gt, mse_weight, ce_weight):
    stu = stu.astype(jnp.float32)
    tea = tea.astype(jnp.float32)
    mse = jnp.mean((stu - tea) ** 2)
    logp = jax.nn.log_softmax(stu, axis=-1)
    ce = -jnp.mean(jnp.take_along_axis(logp, gt[:, None].astype(jnp.int32),
                                       axis=-1))
    return mse_weight * mse + ce_weight * ce


if __name__ == "__main__":
    key = jax.random.PRNGKey(0)
    k1, k2, k3 = jax.random.split(key, 3)

    # Small logits consistent with the module: (batch, num_classes) + labels.
    N, C = 16, 32
    stu = jax.random.normal(k1, (N, C), dtype=jnp.float32)
    tea = jax.random.normal(k2, (N, C), dtype=jnp.float32)
    gt = jax.random.randint(k3, (N,), 0, C, dtype=jnp.int32)

    # 1) Both terms active (row-structured MSE+CE kernel).
    loss = mse_gt_loss(stu, tea, gt, mse_weight=1.0, ce_weight=0.5)
    jax.block_until_ready(loss)
    ref = _reference(stu, tea, gt, 1.0, 0.5)
    assert jnp.allclose(loss, ref, rtol=1e-5, atol=1e-5), (loss, ref)

    # 2) Module defaults (ce_weight=0): lane-dense MSE-only kernel.
    loss_def = mse_gt_loss(stu, tea, gt)
    jax.block_until_ready(loss_def)
    ref_def = _reference(stu, tea, gt, 1.0, 0.0)
    assert jnp.allclose(loss_def, ref_def, rtol=1e-5, atol=1e-5), (loss_def, ref_def)

    # 3) Ragged shapes: exercises partial-block masking in the CE path.
    N2, C2 = 10, 24
    stu2 = jax.random.normal(k1, (N2, C2), dtype=jnp.float32)
    tea2 = jax.random.normal(k2, (N2, C2), dtype=jnp.float32)
    gt2 = jax.random.randint(k3, (N2,), 0, C2, dtype=jnp.int32)
    loss2 = mse_gt_loss(stu2, tea2, gt2, mse_weight=0.7, ce_weight=0.3)
    jax.block_until_ready(loss2)
    ref2 = _reference(stu2, tea2, gt2, 0.7, 0.3)
    assert jnp.allclose(loss2, ref2, rtol=1e-5, atol=1e-5), (loss2, ref2)

    # 4) CE-only configuration: teacher logits are never DMA'd.
    loss3 = mse_gt_loss(stu2, tea2, gt2, mse_weight=0.0, ce_weight=1.0)
    jax.block_until_ready(loss3)
    ref3 = _reference(stu2, tea2, gt2, 0.0, 1.0)
    assert jnp.allclose(loss3, ref3, rtol=1e-5, atol=1e-5), (loss3, ref3)

    # 5) MSE-only with total not divisible by 128 (2-D fallback + tail mask).
    loss4 = mse_gt_loss(stu2, tea2, gt2, mse_weight=1.0, ce_weight=0.0)
    jax.block_until_ready(loss4)
    ref4 = _reference(stu2, tea2, gt2, 1.0, 0.0)
    assert jnp.allclose(loss4, ref4, rtol=1e-5, atol=1e-5), (loss4, ref4)

    print("KERNEL_OK")
</pallas_src>

<mosaic_0001>
module attributes {stable_mosaic.version = 11 : i64} {
  func.func @_mse_ce_kernel(%arg0: i32, %arg1: memref<16x32xf32, #tpu.memory_space<vmem>>, %arg2: memref<16x32xf32, #tpu.memory_space<vmem>>, %arg3: memref<16x1xi32, #tpu.memory_space<vmem>>, %arg4: memref<1x8x32xf32, #tpu.memory_space<vmem>>, %arg5: memref<1x8x1xf32, #tpu.memory_space<vmem>>) attributes {dimension_semantics = [#tpu.dimension_semantics<parallel>], iteration_bounds = array<i64: 1>, scalar_prefetch = 0 : i64, scratch_operands = 0 : i64, tpu.core_type = #tpu.core_type<tc>, window_params = [{transform_indices = @transform_0, window_bounds = array<i64: 16, 32>}, {transform_indices = @transform_1, window_bounds = array<i64: 16, 32>}, {transform_indices = @transform_2, window_bounds = array<i64: 16, 1>}, {transform_indices = @transform_3, window_bounds = array<i64: 1, 8, 32>}, {transform_indices = @transform_4, window_bounds = array<i64: 1, 8, 1>}]} {
    %c0 = arith.constant 0 : index
    %c0_0 = arith.constant 0 : index
    %0 = vector.load %arg1[%c0, %c0_0] : memref<16x32xf32, #tpu.memory_space<vmem>>, vector<16x32xf32>
    %c0_1 = arith.constant 0 : index
    %c0_2 = arith.constant 0 : index
    %1 = vector.load %arg2[%c0_1, %c0_2] : memref<16x32xf32, #tpu.memory_space<vmem>>, vector<16x32xf32>
    %2 = arith.subf %0, %1 : vector<16x32xf32>
    %3 = arith.mulf %2, %2 : vector<16x32xf32>
    %4 = vector.shape_cast %3 : vector<16x32xf32> to vector<2x8x32xf32>
    %cst = arith.constant dense<0.000000e+00> : vector<8x32xf32>
    %5 = vector.multi_reduction <add>, %4, %cst [0] : vector<2x8x32xf32> to vector<8x32xf32>
    %c0_3 = arith.constant 0 : index
    %c0_4 = arith.constant 0 : index
    %c0_5 = arith.constant 0 : index
    %6 = vector.load %arg4[%c0_3, %c0_4, %c0_5] : memref<1x8x32xf32, #tpu.memory_space<vmem>>, vector<1x8x32xf32>
    %7 = vector.shape_cast %6 : vector<1x8x32xf32> to vector<8x32xf32>
    %8 = vector.shape_cast %5 : vector<8x32xf32> to vector<1x8x32xf32>
    tpu.vector_store %arg4[%c0_3, %c0_4, %c0_5], %8 {strides = array<i32>} : memref<1x8x32xf32, #tpu.memory_space<vmem>>, vector<1x8x32xf32>,
    %cst_6 = arith.constant dense<0xFF800000> : vector<16xf32>
    %9 = vector.multi_reduction <maximumf>, %0, %cst_6 [1] : vector<16x32xf32> to vector<16xf32>
    %10 = vector.shape_cast %9 : vector<16xf32> to vector<16x1xf32>
    %11 = vector.broadcast %10 : vector<16x1xf32> to vector<16x32xf32>
    %12 = arith.subf %0, %11 : vector<16x32xf32>
    %13 = math.exp %12 : vector<16x32xf32>
    %cst_7 = arith.constant dense<0.000000e+00> : vector<16xf32>
    %14 = vector.multi_reduction <add>, %13, %cst_7 [1] : vector<16x32xf32> to vector<16xf32>
    %15 = vector.shape_cast %14 : vector<16xf32> to vector<16x1xf32>
    %16 = math.log %15 : vector<16x1xf32>
    %17 = arith.addf %16, %10 : vector<16x1xf32>
    %c0_8 = arith.constant 0 : index
    %c0_9 = arith.constant 0 : index
    %18 = vector.load %arg3[%c0_8, %c0_9] : memref<16x1xi32, #tpu.memory_space<vmem>>, vector<16x1xi32>
    %19 = tpu.iota {dimensions = array<i32: 1>} : vector<16x32xi32>
    %20 = vector.broadcast %18 : vector<16x1xi32> to vector<16x32xi32>
    %21 = arith.cmpi eq, %19, %20 : vector<16x32xi32>
    %cst_10 = arith.constant 0.000000e+00 : f32
    %22 = vector.broadcast %cst_10 : f32 to vector<16x32xf32>
    %23 = arith.select %21, %0, %22 : vector<16x32xi1>, vector<16x32xf32>
    %cst_11 = arith.constant dense<0.000000e+00> : vector<16xf32>
    %24 = vector.multi_reduction <add>, %23, %cst_11 [1] : vector<16x32xf32> to vector<16xf32>
    %25 = vector.shape_cast %24 : vector<16xf32> to vector<16x1xf32>
    %26 = arith.subf %17, %25 : vector<16x1xf32>
    %27 = vector.shape_cast %26 : vector<16x1xf32> to vector<2x8x1xf32>
    %cst_12 = arith.constant dense<0.000000e+00> : vector<8x1xf32>
    %28 = vector.multi_reduction <add>, %27, %cst_12 [0] : vector<2x8x1xf32> to vector<8x1xf32>
    %c0_13 = arith.constant 0 : index
    %c0_14 = arith.constant 0 : index
    %c0_15 = arith.constant 0 : index
    %29 = vector.load %arg5[%c0_13, %c0_14, %c0_15] : memref<1x8x1xf32, #tpu.memory_space<vmem>>, vector<1x8x1xf32>
    %30 = vector.shape_cast %29 : vector<1x8x1xf32> to vector<8x1xf32>
    %31 = vector.shape_cast %28 : vector<8x1xf32> to vector<1x8x1xf32>
    tpu.vector_store %arg5[%c0_13, %c0_14, %c0_15], %31 {strides = array<i32>} : memref<1x8x1xf32, #tpu.memory_space<vmem>>, vector<1x8x1xf32>,
    return
  }
  func.func @transform_0(%arg0: i32) -> (i32, i32) {
    %c0_i32 = arith.constant 0 : i32
    %c0_i32_0 = arith.constant 0 : i32
    return %arg0, %c0_i32 : i32, i32
  }
  func.func @transform_1(%arg0: i32) -> (i32, i32) {
    %c0_i32 = arith.constant 0 : i32
    %c0_i32_0 = arith.constant 0 : i32
    return %arg0, %c0_i32 : i32, i32
  }
  func.func @transform_2(%arg0: i32) -> (i32, i32) {
    %c0_i32 = arith.constant 0 : i32
    %c0_i32_0 = arith.constant 0 : i32
    return %arg0, %c0_i32 : i32, i32
  }
  func.func @transform_3(%arg0: i32) -> (i32, i32, i32) {
    %c0_i32 = arith.constant 0 : i32
    %c0_i32_0 = arith.constant 0 : i32
    %c0_i32_1 = arith.constant 0 : i32
    return %arg0, %c0_i32, %c0_i32_0 : i32, i32, i32
  }
  func.func @transform_4(%arg0: i32) -> (i32, i32, i32) {
    %c0_i32 = arith.constant 0 : i32
    %c0_i32_0 = arith.constant 0 : i32
    %c0_i32_1 = arith.constant 0 : i32
    return %arg0, %c0_i32, %c0_i32_0 : i32, i32, i32
  }
}

</mosaic_0001>

<bundles_post_ra>
// kernel: tpu_custom_call.1
= control target key start
LH: loop header
LB: loop body
LE: loop exit
PB: predicated region body
PF: predicated region fallthrough
CT: control target
= control target key end

     0   :  { %10 = vsyncpa [#allocation3], 0  ;;  %s253_s0 = inlined_call_operand.vmem [shape: f32[16,32], index: 0, kind: input, shape index: {}]   ;;  %s254_s1 = inlined_call_operand.hbm [shape: f32[16,32], index: 1, kind: input, shape index: {}]   ;;  %s255_s2 = inlined_call_operand.vmem [shape: s32[16,1], index: 2, kind: input, shape index: {}]   ;;  %s256_s3 = inlined_call_operand.hbm [shape: f32[1,8,32], index: 3, kind: output, shape index: {0}]   ;;  %s257_s4 = inlined_call_operand.vmem [shape: f32[1,8,1], index: 4, kind: output, shape index: {1}]  }
   0x1   :  { %11 = vsyncpa [#allocation4], 0  ;;  %s175_s15 = smov [#allocation2]   ;;  %s127_s19 = scalar_lea.hbm %s254_s1, 256 }
   0x2   :  { %s19_s16 = sshll.u32 %s175_s15, 4  ;;  %p128_p0 = scmp.ne.s32.totalorder %s254_s1, %s127_s19  ;;  %s20_s16 = int_to_ptr.vmem [resolvable:$true] %s19_s16 }
   0x3   :  { %p131_p1 = scmp.lt.u32.totalorder %s127_s19, %s254_s1 }
   0x5   :  { %p133_p2 = pnand %p131_p1, %p128_p0 }
   0x7   :  { %136 = shalt.err (!%p133_p2)
}
   0x8   :  { %s137_s24 = scalar_lea.vmem %s20_s16, 256  ;;  %p142_p4 = scmp.lt.s32.totalorder %s20_s16, %s20_s16 }
   0x9   :  { %p138_p3 = scmp.ne.s32.totalorder %s20_s16, %s137_s24  ;;  %p143_p5 = scmp.lt.s32.totalorder %s137_s24, %s137_s24 }
   0xb   :  { %p144_p6 = por %p143_p5, %p142_p4 }
   0xd   :  { %p145_p7 = pnand %p144_p6, %p138_p3 }
   0xf   :  { %148 = shalt.err (!%p145_p7)
}
  0x10   :  { %s176_s25 = smov 128   ;;  %s177_s26 = smov 8  }
  0x11   :  { %25 = dma.hbm_to_vmem [thread:$0]  %s254_s1, 256, %s20_s16, [#allocation3], %s176_s25, %s176_s25, %s177_s26  }
  0x12   :  { %171 = dma.done.wait [#allocation3], 256  }
  0x13   :  { %172 = vsyncadd [#allocation3], 4294967040  ;;  %v178_v0 = vmov 0   ;;  %vm39_vm0 = vcmask 261120   ;;  %v31_v1 = vld [vmem:[%s253_s0] sm:$0xff]  ;;  %v32_v2 = vld [vmem:[%s253_s0 + $0x8] sm:$0xff]  ;;  %v70_v11 = vlaneseq }
  0x14   :  { %117 = vset.pattern.permute.xlu1 %v178_v0  ;;  %118 = vset.pattern.permute.xlu0 %v178_v0  ;;  %v44_v3 = vsel %vm39_vm0, %v31_v1, -inf  ;;  %v68_v4 = vld [vmem:[%s255_s2] sm:$0xff]  ;;  %v47_v5 = vsel %vm39_vm0, %v32_v2, -inf  ;;  %v69_v6 = vld [vmem:[%s255_s2 + $0x8] sm:$0xff]  ;;  %s179_s0 = smov [#allocation5]  }
  0x15   :  { %45 = vmax.xlane.f32.xlu0 %v44_v3  ;;  %73 = vperm.xlu1 %117, %v68_v4   ;;  %v71_v15 = vand.u32 127, %v70_v11  ;;  %v33_v25 = vld [vmem:[#allocation2] sm:$0xff]  ;;  %v34_v26 = vld [vmem:[#allocation2 + $0x8] sm:$0xff]  ;;  %s99_s2 = sshll.u32 %s179_s0, 4  ;;  %s100_s2 = int_to_ptr.vmem [resolvable:$true] %s99_s2 }
  0x16   :  { %v35_v27 = vsub.f32 %v31_v1, %v33_v25  ;;  %v36_v28 = vsub.f32 %v32_v2, %v34_v26  ;;  %s149_s10 = scalar_lea.vmem %s100_s2, 128  ;;  %p154_p9 = scmp.lt.s32.totalorder %s100_s2, %s100_s2 }
  0x17   :  { %p150_p8 = scmp.ne.s32.totalorder %s100_s2, %s149_s10  ;;  %p155_p10 = scmp.lt.s32.totalorder %s149_s10, %s149_s10 }
  0x18   :  { %v37_v29 = vmul.f32 %v35_v27, %v35_v27  ;;  %v38_v30 = vmul.f32 %v36_v28, %v36_v28 }
  0x19   :  { %48 = vmax.xlane.f32.xlu0 %v47_v5  ;;  %76 = vperm.xlu1 %117, %v69_v6   ;;  %p156_p11 = por %p155_p10, %p154_p9 }
  0x1a   :  { %v40_v31 = vsel %vm39_vm0, %v37_v29, 0.0  ;;  %v41_v32 = vsel %vm39_vm0, %v38_v30, 0.0 }
  0x1b   :  { %v42_v33 = vadd.f32 %v41_v32, %v40_v31  ;;  %p157_p12 = pnand %p156_p11, %p150_p8 }
  0x1d   :  { %43 = vst.msk [vmem:[#allocation5] sm:$0xff] %vm39_vm0, %v42_v33 }
  0x94   :  { %v74_v14 = vpop.permute.xlu1 %73 }
  0x95   :  { %vm78_vm1 = vcmp.eq.s32.totalorder %v71_v15, %v74_v14 }
  0x96   :  { %v80_v18 = vsel %vm78_vm1, %v31_v1, 0.0 }
  0x97   :  { %v82_v20 = vsel %vm39_vm0, %v80_v18, 0.0 }
  0x98   :  { %v77_v16 = vpop.permute.xlu1 %76 }
  0x99   :  { %vm79_vm2 = vcmp.eq.s32.totalorder %v71_v15, %v77_v16 }
  0x9a   :  { %v81_v22 = vsel %vm79_vm2, %v32_v2, 0.0 }
  0x9b   :  { %v85_v24 = vsel %vm39_vm0, %v81_v22, 0.0 }
  0xa2   :  { %v46_v7 = vpop.xlane.xlu0 %45 }
  0xa3   :  { %v50_v8 = vsub.f32 %v31_v1, %v46_v7 }
  0xa5   :  { %v52_v9 = vmul.f32 1.442695, %v50_v8 }
  0xa6   :  { %v49_v10 = vpop.xlane.xlu0 %48 }
  0xa7   :  { %119 = vpow2.f32 %v52_v9  ;;  %v51_v12 = vsub.f32 %v32_v2, %v49_v10 }
  0xa9   :  { %v54_v13 = vmul.f32 1.442695, %v51_v12 }
  0xab   :  { %121 = vpow2.f32 %v54_v13 }
  0xb1   :  { %v120_v17 = vpop.eup %119 }
  0xb2   :  { %v56_v19 = vsel %vm39_vm0, %v120_v17, 0.0 }
  0xb3   :  { %57 = vadd.xlane.f32.xlu0 %v56_v19 }
  0xb5   :  { %v122_v21 = vpop.eup %121 }
  0xb6   :  { %v59_v23 = vsel %vm39_vm0, %v122_v21, 0.0 }
  0xb7   :  { %60 = vadd.xlane.f32.xlu1 %v59_v23  ;;  %83 = vadd.xlane.f32.xlu0 %v82_v20 }
  0xbb   :  { %86 = vadd.xlane.f32.xlu0 %v85_v24 }
  0xbc   :  { %160 = shalt.err (!%p157_p12)
}
  0xbd   :  { %s161_s13 = scalar_lea.hbm %s256_s3, 128 }
  0xbe   :  { %p162_p13 = scmp.ne.s32.totalorder %s256_s3, %s161_s13  ;;  %p165_p0 = scmp.lt.u32.totalorder %s161_s13, %s256_s3 }
  0xc0   :  { %p167_p1 = pnand %p165_p0, %p162_p13 }
  0xc2   :  { %170 = shalt.err (!%p167_p1)
}
  0xc3   :  { %102 = dma.vmem_to_hbm [thread:$0]  %s100_s2, 128, %s256_s3, [#allocation4]   ;;  %vm91_vm3 = vcmask 7168  }
 0x140   :  { %v58_v34 = vpop.xlane.xlu0 %57 }
 0x141   :  { %123 = vlog2.f32 %v58_v34 }
 0x144   :  { %v61_v35 = vpop.xlane.xlu1 %60  ;;  %v84_v38 = vpop.xlane.xlu0 %83 }
 0x145   :  { %125 = vlog2.f32 %v61_v35 }
 0x148   :  { %v87_v43 = vpop.xlane.xlu0 %86 }
 0x14b   :  { %v124_v36 = vpop.eup %123 }
 0x14c   :  { %v63_v37 = vmul.f32 0.6931472, %v124_v36 }
 0x14e   :  { %v66_v41 = vadd.f32 %v63_v37, %v46_v7 }
 0x14f   :  { %v126_v39 = vpop.eup %125 }
 0x150   :  { %v65_v40 = vmul.f32 0.6931472, %v126_v39  ;;  %v88_v44 = vsub.f32 %v66_v41, %v84_v38 }
 0x152   :  { %v67_v42 = vadd.f32 %v65_v40, %v49_v10 }
 0x154   :  { %v89_v45 = vsub.f32 %v67_v42, %v87_v43 }
 0x156   :  { %v90_v46 = vadd.f32 %v89_v45, %v88_v44 }
 0x158   :  { %92 = vst.msk [vmem:[%s257_s4] sm:$0xff] %vm91_vm3, %v90_v46 }
 0x159   :  { %173 = dma.done.wait [#allocation4], 128  }
 0x15a   :  { %174 = vsyncadd [#allocation4], 4294967168 }
 0x15b   :  { %110 = vsyncpa [#allocation3], 1 }
 0x15c   :  { %111 = vsyncpa [#allocation4], 1 }

</bundles_post_ra>
